<compile_context>
chip_gen: v7x
topology: tpu7x:2x2x1
jax: 0.10.0
libtpu: 0.0.40
codegen_flags: <defaults>
</compile_context>

<pallas_src>
import math
import functools

import jax
import jax.numpy as jnp
from jax.experimental import pallas as pl
from jax.experimental.pallas import tpu as pltpu


# ----------------------------------------------------------------------------
# In-kernel helpers.
# ----------------------------------------------------------------------------

def _layer_norm(x, gamma, eps=1e-5):
    """F.layer_norm over last dim, weight=gamma, bias=None (biased variance)."""
    mu = jnp.mean(x, axis=-1, keepdims=True)
    xc = x - mu
    var = jnp.mean(xc * xc, axis=-1, keepdims=True)
    return xc * jax.lax.rsqrt(var + eps) * gamma


def _erf(x):
    # Abramowitz & Stegun 7.1.26 (max abs err ~1.5e-7): only exp/mul/add/where,
    # guaranteed to lower on the VPU/EUP.
    a1, a2, a3, a4, a5 = (0.254829592, -0.284496736, 1.421413741,
                          -1.453152027, 1.061405429)
    p = 0.3275911
    ax = jnp.abs(x)
    t = 1.0 / (1.0 + p * ax)
    poly = ((((a5 * t + a4) * t + a3) * t + a2) * t + a1) * t
    y = 1.0 - poly * jnp.exp(-ax * ax)
    return jnp.where(x >= 0, y, -y)


def _gelu_exact(x):
    return 0.5 * x * (1.0 + _erf(x * (1.0 / math.sqrt(2.0))))


# ----------------------------------------------------------------------------
# Per-generation defaults.
# ----------------------------------------------------------------------------

def _auto_config():
    kind = ""
    try:
        kind = jax.devices()[0].device_kind.lower()
    except Exception:  # pragma: no cover - defensive
        pass
    if "v5" in kind:       # 128 MiB VMEM, 128-wide MXUs
        return dict(q_block=128, kv_block=128, t_block=512, cm_block=2048,
                    vmem_limit_bytes=100 * 1024 * 1024)
    if "v6" in kind:       # 128 MiB VMEM, 256-wide MXUs
        return dict(q_block=256, kv_block=256, t_block=512, cm_block=2048,
                    vmem_limit_bytes=100 * 1024 * 1024)
    if "v7" in kind or "7x" in kind:   # 64 MiB VMEM per TensorCore, 256-wide MXUs
        return dict(q_block=256, kv_block=256, t_block=256, cm_block=512,
                    vmem_limit_bytes=44 * 1024 * 1024)
    return dict(q_block=128, kv_block=128, t_block=256, cm_block=1024,
                vmem_limit_bytes=64 * 1024 * 1024)


# ----------------------------------------------------------------------------
# Kernel 1: Q, K, V = LN1(x) @ [Wq | Wk | Wv] + b   (hoisted out of the KV loop)
# ----------------------------------------------------------------------------

def _qkv_proj_kernel(x_ref, g1_ref, wqkv_ref, bqkv_ref, q_ref, k_ref, v_ref,
                     *, compute_dtype):
    cd = compute_dtype
    C = x_ref.shape[2]
    xn = _layer_norm(x_ref[0], g1_ref[...])
    qkv = (jnp.dot(xn.astype(cd), wqkv_ref[...],
                   preferred_element_type=jnp.float32) + bqkv_ref[...])
    q_ref[0] = qkv[:, :C].astype(q_ref.dtype)
    k_ref[0] = qkv[:, C:2 * C].astype(k_ref.dtype)
    v_ref[0] = qkv[:, 2 * C:].astype(v_ref.dtype)


def _qkv_projection(x, params, *, compute_dtype, t_block, vmem_limit_bytes):
    B, T, C = x.shape
    tb = min(t_block, T)
    assert T % tb == 0
    cd = compute_dtype

    g1 = params['ln1_g'].reshape(1, C).astype(jnp.float32)
    wqkv = jnp.concatenate(
        [params['wq'].T, params['wk'].T, params['wv'].T], axis=1).astype(cd)  # (C, 3C)
    bqkv = jnp.concatenate(
        [params['bq'], params['bk'], params['bv']]).reshape(1, 3 * C).astype(jnp.float32)

    const = lambda b, t: (0, 0)
    x_spec = pl.BlockSpec((1, tb, C), lambda b, t: (b, t, 0))
    out_spec = pl.BlockSpec((1, tb, C), lambda b, t: (b, t, 0))
    out_sds = jax.ShapeDtypeStruct((B, T, C), cd)

    kernel = functools.partial(_qkv_proj_kernel, compute_dtype=cd)
    return pl.pallas_call(
        kernel,
        out_shape=(out_sds, out_sds, out_sds),
        grid_spec=pltpu.PrefetchScalarGridSpec(
            num_scalar_prefetch=0,
            grid=(B, T // tb),
            in_specs=[
                x_spec,
                pl.BlockSpec((1, C), const),        # ln1 gamma
                pl.BlockSpec((C, 3 * C), const),    # fused Wqkv (in, out)
                pl.BlockSpec((1, 3 * C), const),    # fused bias
            ],
            out_specs=(out_spec, out_spec, out_spec),
        ),
        compiler_params=pltpu.CompilerParams(
            dimension_semantics=("parallel", "parallel"),
            vmem_limit_bytes=vmem_limit_bytes),
    )(x, g1, wqkv, bqkv)


# ----------------------------------------------------------------------------
# Kernel 2: y = x + proj(causal_flash_attention(Q, K, V))
# ----------------------------------------------------------------------------

def _attn_block_kernel(x_ref, q_ref, k_ref, v_ref, wp_ref, bp_ref, o_ref,
                       m_sc, l_sc, acc_sc, *, n_heads, compute_dtype):
    cd = compute_dtype
    qb = q_ref.shape[1]
    kb = k_ref.shape[1]
    C = q_ref.shape[2]
    H = n_heads
    D = C // H
    scale = 1.0 / math.sqrt(D)

    qi = pl.program_id(1)
    ki = pl.program_id(2)
    q_start = qi * qb
    k_start = ki * kb
    last_vis = (q_start + qb - 1) // kb     # last KV tile with any unmasked entry

    # ---- init on the first KV tile of this (batch, q-tile) ------------------
    @pl.when(ki == 0)
    def _init():
        m_sc[...] = jnp.full_like(m_sc, -1e30)
        l_sc[...] = jnp.zeros_like(l_sc)
        acc_sc[...] = jnp.zeros_like(acc_sc)

    # ---- one KV tile: online softmax update (Q/K/V already projected) -------
    def _process(apply_mask):
        q = q_ref[0].reshape(qb, H, D)
        k = k_ref[0].reshape(kb, H, D)
        v = v_ref[0].reshape(kb, H, D)
        s = jnp.einsum('thd,shd->hts', q, k,
                       preferred_element_type=jnp.float32) * scale
        if apply_mask:  # only diagonal-crossing tiles pay for mask generation
            rows = q_start + jax.lax.broadcasted_iota(jnp.int32, (qb, kb), 0)
            cols = k_start + jax.lax.broadcasted_iota(jnp.int32, (qb, kb), 1)
            s = jnp.where((rows >= cols)[None, :, :], s, -1e30)

        m_prev = m_sc[...]
        m_new = jnp.maximum(m_prev, jnp.max(s, axis=-1, keepdims=True))
        alpha = jnp.exp(m_prev - m_new)
        p = jnp.exp(s - m_new)
        l_sc[...] = alpha * l_sc[...] + jnp.sum(p, axis=-1, keepdims=True)
        acc_sc[...] = alpha * acc_sc[...] + jnp.einsum(
            'hts,shd->htd', p.astype(cd), v, preferred_element_type=jnp.float32)
        m_sc[...] = m_new

    visible = ki <= last_vis                       # tile has >=1 unmasked entry
    full = (k_start + kb - 1) <= q_start           # tile fully below the diagonal

    @pl.when(jnp.logical_and(visible, full))
    def _full_tile():
        _process(apply_mask=False)

    @pl.when(jnp.logical_and(visible, jnp.logical_not(full)))
    def _diag_tile():
        _process(apply_mask=True)

    # ---- finalize at the LAST VISIBLE KV tile --------------------------------
    # Trailing fully-masked steps do no work and (via the clamped index_map) no
    # DMA.  No later step touches o_ref or the scratch for this (batch, q-tile),
    # so the deferred output write-back remains correct.
    @pl.when(ki == last_vis)
    def _finalize():
        approx = jnp.dtype(cd) == jnp.dtype(jnp.bfloat16)
        inv_l = pl.reciprocal(l_sc[...], approx=approx)       # (H, qb, 1)
        y = acc_sc[...] * inv_l                               # (H, qb, D)
        # Single small head-merge transpose per q-tile (head-major state avoids
        # per-KV-step transposes since dot_general outputs are batch-major).
        y = jnp.transpose(y, (1, 0, 2)).reshape(qb, C)
        yp = (jnp.dot(y.astype(cd), wp_ref[...],
                      preferred_element_type=jnp.float32) + bp_ref[...])
        o_ref[0] = (x_ref[0] + yp).astype(o_ref.dtype)        # residual add


def _attention_block(x, q, k, v, params, n_heads, *, compute_dtype,
                     q_block, kv_block, vmem_limit_bytes):
    B, T, C = x.shape
    qb = min(q_block, T)
    kb = min(kv_block, T)
    assert T % qb == 0 and T % kb == 0
    cd = compute_dtype
    H = n_heads
    D = C // H

    wp = params['wp'].T.astype(cd)                       # (C, C) (in, out)
    bp = params['bp'].reshape(1, C).astype(jnp.float32)

    const = lambda b, qi, ki: (0, 0)
    q_map = lambda b, qi, ki: (b, qi, 0)

    def kv_map(b, qi, ki):
        # Clamp to the last visible tile: for trailing fully-masked KV steps the
        # block index does not change, so Pallas elides those DMAs entirely.
        last_vis = (qi * qb + qb - 1) // kb
        return (b, jnp.minimum(ki, last_vis), 0)

    kernel = functools.partial(_attn_block_kernel, n_heads=n_heads,
                               compute_dtype=cd)
    return pl.pallas_call(
        kernel,
        out_shape=jax.ShapeDtypeStruct((B, T, C), x.dtype),
        grid_spec=pltpu.PrefetchScalarGridSpec(
            num_scalar_prefetch=0,
            grid=(B, T // qb, T // kb),
            in_specs=[
                pl.BlockSpec((1, qb, C), q_map),     # x (residual)
                pl.BlockSpec((1, qb, C), q_map),     # Q (pre-projected)
                pl.BlockSpec((1, kb, C), kv_map),    # K (pre-projected, clamped)
                pl.BlockSpec((1, kb, C), kv_map),    # V (pre-projected, clamped)
                pl.BlockSpec((C, C), const),         # Wproj (in, out)
                pl.BlockSpec((1, C), const),         # bproj
            ],
            out_specs=pl.BlockSpec((1, qb, C), q_map),
            scratch_shapes=[
                pltpu.VMEM((H, qb, 1), jnp.float32),   # running max
                pltpu.VMEM((H, qb, 1), jnp.float32),   # running denominator
                pltpu.VMEM((H, qb, D), jnp.float32),   # running numerator
            ],
        ),
        compiler_params=pltpu.CompilerParams(
            dimension_semantics=("parallel", "parallel", "arbitrary"),
            vmem_limit_bytes=vmem_limit_bytes),
    )(x, q, k, v, wp, bp)


# ----------------------------------------------------------------------------
# Kernel 3: o = y + W2 @ gelu(W1 @ ln2(y) + b1) + b2   (hidden dim tiled)
# ----------------------------------------------------------------------------

def _mlp_block_kernel(x_ref, g2_ref, w1_ref, b1_ref, w2_ref, b2_ref, o_ref,
                      xn_sc, acc_sc, *, compute_dtype):
    cd = compute_dtype
    ck = pl.program_id(2)

    @pl.when(ck == 0)
    def _init():
        xn_sc[...] = _layer_norm(x_ref[0], g2_ref[...]).astype(cd)  # LN2 once
        acc_sc[...] = jnp.zeros_like(acc_sc)

    # One hidden-dim chunk: (tb, cb) activations, streamed W1/W2 blocks.
    h = (jnp.dot(xn_sc[...], w1_ref[...],
                 preferred_element_type=jnp.float32) + b1_ref[...])
    h = _gelu_exact(h)
    acc_sc[...] += jnp.dot(h.astype(cd), w2_ref[...],
                           preferred_element_type=jnp.float32)

    @pl.when(ck == pl.num_programs(2) - 1)
    def _finalize():
        o_ref[0] = (x_ref[0] + acc_sc[...] + b2_ref[...]).astype(o_ref.dtype)


def _mlp_block(x, params, *, compute_dtype, t_block, cm_block, vmem_limit_bytes):
    B, T, C = x.shape
    tb = min(t_block, T)
    assert T % tb == 0
    cd = compute_dtype
    Cm = params['w1'].shape[0]                       # hidden = 4*C
    cb = min(cm_block, Cm)
    if Cm % cb != 0:
        cb = Cm                                      # fall back to a single chunk

    g2 = params['ln2_g'].reshape(1, C).astype(jnp.float32)
    w1 = params['w1'].T.astype(cd)                   # (C, 4C)
    b1 = params['b1'].reshape(1, Cm).astype(jnp.float32)
    w2 = params['w2'].T.astype(cd)                   # (4C, C)
    b2 = params['b2'].reshape(1, C).astype(jnp.float32)

    const = lambda b, t, ck: (0, 0)
    x_spec = pl.BlockSpec((1, tb, C), lambda b, t, ck: (b, t, 0))

    kernel = functools.partial(_mlp_block_kernel, compute_dtype=cd)
    return pl.pallas_call(
        kernel,
        out_shape=jax.ShapeDtypeStruct((B, T, C), x.dtype),
        grid_spec=pltpu.PrefetchScalarGridSpec(
            num_scalar_prefetch=0,
            grid=(B, T // tb, Cm // cb),
            in_specs=[
                x_spec,
                pl.BlockSpec((1, C), const),                    # ln2 gamma
                pl.BlockSpec((C, cb), lambda b, t, ck: (0, ck)),  # W1 column block
                pl.BlockSpec((1, cb), lambda b, t, ck: (0, ck)),  # b1 block
                pl.BlockSpec((cb, C), lambda b, t, ck: (ck, 0)),  # W2 row block
                pl.BlockSpec((1, C), const),                    # b2
            ],
            out_specs=x_spec,
            scratch_shapes=[
                pltpu.VMEM((tb, C), cd),            # cached LN2(x)
                pltpu.VMEM((tb, C), jnp.float32),   # f32 accumulator
            ],
        ),
        compiler_params=pltpu.CompilerParams(
            dimension_semantics=("parallel", "parallel", "arbitrary"),
            vmem_limit_bytes=vmem_limit_bytes),
    )(x, g2, w1, b1, w2, b2)


# ----------------------------------------------------------------------------
# Public wrapper: full EncoderBlock forward (eval mode).
# ----------------------------------------------------------------------------

def encoder_block(x, params, n_heads, *, compute_dtype=jnp.bfloat16,
                  q_block=None, kv_block=None, t_block=None, cm_block=None,
                  vmem_limit_bytes=None):
    """x: (B, T, C) f32. params: PyTorch-convention (out,in) weights + ln gammas."""
    cfg = _auto_config()
    q_block = cfg['q_block'] if q_block is None else q_block
    kv_block = cfg['kv_block'] if kv_block is None else kv_block
    t_block = cfg['t_block'] if t_block is None else t_block
    cm_block = cfg['cm_block'] if cm_block is None else cm_block
    vmem_limit_bytes = (cfg['vmem_limit_bytes'] if vmem_limit_bytes is None
                        else vmem_limit_bytes)

    B, T, C = x.shape
    assert C % n_heads == 0

    q, k, v = _qkv_projection(x, params, compute_dtype=compute_dtype,
                              t_block=t_block, vmem_limit_bytes=vmem_limit_bytes)
    y = _attention_block(x, q, k, v, params, n_heads, compute_dtype=compute_dtype,
                         q_block=q_block, kv_block=kv_block,
                         vmem_limit_bytes=vmem_limit_bytes)
    return _mlp_block(y, params, compute_dtype=compute_dtype, t_block=t_block,
                      cm_block=cm_block, vmem_limit_bytes=vmem_limit_bytes)


# ----------------------------------------------------------------------------
# Pure-JAX reference mirroring the PyTorch EncoderBlock forward (eval mode).
# ----------------------------------------------------------------------------

def _reference(x, params, n_heads):
    def ln(x_, g):
        mu = x_.mean(-1, keepdims=True)
        var = ((x_ - mu) ** 2).mean(-1, keepdims=True)
        return (x_ - mu) / jnp.sqrt(var + 1e-5) * g

    def lin(x_, w, b):
        return x_ @ w.T + b

    B, T, C = x.shape
    D = C // n_heads
    h = ln(x, params['ln1_g'])
    q = lin(h, params['wq'], params['bq']).reshape(B, T, n_heads, D).transpose(0, 2, 1, 3)
    k = lin(h, params['wk'], params['bk']).reshape(B, T, n_heads, D).transpose(0, 2, 1, 3)
    v = lin(h, params['wv'], params['bv']).reshape(B, T, n_heads, D).transpose(0, 2, 1, 3)
    att = (q @ k.transpose(0, 1, 3, 2)) / math.sqrt(D)
    mask = jnp.tril(jnp.ones((T, T)))[None, None]
    att = jnp.where(mask == 0, -jnp.inf, att)
    att = jax.nn.softmax(att, axis=-1)
    y = (att @ v).transpose(0, 2, 1, 3).reshape(B, T, C)
    x = x + lin(y, params['wp'], params['bp'])
    h2 = ln(x, params['ln2_g'])
    m = jax.nn.gelu(lin(h2, params['w1'], params['b1']), approximate=False)
    return x + lin(m, params['w2'], params['b2'])


if __name__ == "__main__":
    B, T, C = 2, 16, 64
    n_heads = 4
    Cm = 4 * C

    key = jax.random.PRNGKey(0)
    ks = jax.random.split(key, 15)
    s1 = 1.0 / math.sqrt(C)
    s2 = 1.0 / math.sqrt(Cm)
    u = lambda k, shape, s: jax.random.uniform(k, shape, jnp.float32, -s, s)
    params = {
        'ln1_g': jax.random.uniform(ks[0], (C,), jnp.float32, 0.5, 1.5),
        'ln2_g': jax.random.uniform(ks[1], (C,), jnp.float32, 0.5, 1.5),
        'wq': u(ks[2], (C, C), s1), 'bq': u(ks[3], (C,), s1),
        'wk': u(ks[4], (C, C), s1), 'bk': u(ks[5], (C,), s1),
        'wv': u(ks[6], (C, C), s1), 'bv': u(ks[7], (C,), s1),
        'wp': u(ks[8], (C, C), s1), 'bp': u(ks[9], (C,), s1),
        'w1': u(ks[10], (Cm, C), s1), 'b1': u(ks[11], (Cm,), s1),
        'w2': u(ks[12], (C, Cm), s2), 'b2': u(ks[13], (C,), s2),
    }
    x = jax.random.normal(ks[14], (B, T, C), jnp.float32)

    ref = _reference(x, params, n_heads)

    # f32 path (module semantics up to MXU f32 default precision); small blocks
    # exercise the flash tiling, the diagonal-mask branch, the unmasked branch,
    # the causal skip / clamped-DMA path, early finalize and MLP hidden tiling.
    out_f32 = encoder_block(x, params, n_heads, compute_dtype=jnp.float32,
                            q_block=8, kv_block=8, t_block=16, cm_block=128,
                            vmem_limit_bytes=64 * 1024 * 1024)
    out_f32 = jax.block_until_ready(out_f32)
    assert out_f32.shape == (B, T, C)
    assert jnp.allclose(out_f32, ref, atol=1e-3, rtol=1e-3), "f32 mismatch vs reference"

    # bf16-compute / f32-accumulate path (default, per perf guidance).
    out_bf16 = encoder_block(x, params, n_heads, compute_dtype=jnp.bfloat16,
                             q_block=8, kv_block=8, t_block=16, cm_block=128,
                             vmem_limit_bytes=64 * 1024 * 1024)
    out_bf16 = jax.block_until_ready(out_bf16)
    assert jnp.allclose(out_bf16, ref, atol=5e-2, rtol=5e-2), "bf16 mismatch vs reference"

    print("KERNEL_OK")
</pallas_src>

<mosaic_0001>
module attributes {stable_mosaic.version = 11 : i64} {
  func.func @_qkv_proj_kernel(%arg0: i32, %arg1: i32, %arg2: memref<1x16x64xf32, #tpu.memory_space<vmem>>, %arg3: memref<1x64xf32, #tpu.memory_space<vmem>>, %arg4: memref<64x192xf32, #tpu.memory_space<vmem>>, %arg5: memref<1x192xf32, #tpu.memory_space<vmem>>, %arg6: memref<1x16x64xf32, #tpu.memory_space<vmem>>, %arg7: memref<1x16x64xf32, #tpu.memory_space<vmem>>, %arg8: memref<1x16x64xf32, #tpu.memory_space<vmem>>) attributes {dimension_semantics = [#tpu.dimension_semantics<parallel>, #tpu.dimension_semantics<parallel>], iteration_bounds = array<i64: 2, 1>, scalar_prefetch = 0 : i64, scratch_operands = 0 : i64, tpu.core_type = #tpu.core_type<tc>, window_params = [{transform_indices = @transform_0, window_bounds = array<i64: 1, 16, 64>}, {pipeline_mode = #tpu.pipeline_mode<synchronous>, transform_indices = @transform_1, window_bounds = array<i64: 1, 64>}, {pipeline_mode = #tpu.pipeline_mode<synchronous>, transform_indices = @transform_2, window_bounds = array<i64: 64, 192>}, {pipeline_mode = #tpu.pipeline_mode<synchronous>, transform_indices = @transform_3, window_bounds = array<i64: 1, 192>}, {transform_indices = @transform_4, window_bounds = array<i64: 1, 16, 64>}, {transform_indices = @transform_5, window_bounds = array<i64: 1, 16, 64>}, {transform_indices = @transform_6, window_bounds = array<i64: 1, 16, 64>}]} {
    %c0 = arith.constant 0 : index
    %c0_0 = arith.constant 0 : index
    %c0_1 = arith.constant 0 : index
    %0 = vector.load %arg2[%c0, %c0_0, %c0_1] : memref<1x16x64xf32, #tpu.memory_space<vmem>>, vector<1x16x64xf32>
    %1 = vector.shape_cast %0 : vector<1x16x64xf32> to vector<16x64xf32>
    %c0_2 = arith.constant 0 : index
    %c0_3 = arith.constant 0 : index
    %2 = vector.load %arg3[%c0_2, %c0_3] : memref<1x64xf32, #tpu.memory_space<vmem>>, vector<1x64xf32>
    %cst = arith.constant dense<0.000000e+00> : vector<16xf32>
    %3 = vector.multi_reduction <add>, %1, %cst [1] : vector<16x64xf32> to vector<16xf32>
    %4 = vector.shape_cast %3 : vector<16xf32> to vector<16x1xf32>
    %cst_4 = arith.constant 6.400000e+01 : f32
    %5 = vector.broadcast %cst_4 : f32 to vector<16x1xf32>
    %6 = arith.divf %4, %5 : vector<16x1xf32>
    %7 = vector.broadcast %6 : vector<16x1xf32> to vector<16x64xf32>
    %8 = arith.subf %1, %7 : vector<16x64xf32>
    %9 = arith.mulf %8, %8 : vector<16x64xf32>
    %cst_5 = arith.constant dense<0.000000e+00> : vector<16xf32>
    %10 = vector.multi_reduction <add>, %9, %cst_5 [1] : vector<16x64xf32> to vector<16xf32>
    %11 = vector.shape_cast %10 : vector<16xf32> to vector<16x1xf32>
    %cst_6 = arith.constant 6.400000e+01 : f32
    %12 = vector.broadcast %cst_6 : f32 to vector<16x1xf32>
    %13 = arith.divf %11, %12 : vector<16x1xf32>
    %cst_7 = arith.constant 9.99999974E-6 : f32
    %14 = vector.broadcast %cst_7 : f32 to vector<16x1xf32>
    %15 = arith.addf %13, %14 : vector<16x1xf32>
    %16 = math.rsqrt %15 : vector<16x1xf32>
    %17 = vector.broadcast %16 : vector<16x1xf32> to vector<16x64xf32>
    %18 = arith.mulf %8, %17 : vector<16x64xf32>
    %19 = vector.broadcast %2 : vector<1x64xf32> to vector<16x64xf32>
    %20 = arith.mulf %18, %19 : vector<16x64xf32>
    %c0_8 = arith.constant 0 : index
    %c0_9 = arith.constant 0 : index
    %21 = vector.load %arg4[%c0_8, %c0_9] : memref<64x192xf32, #tpu.memory_space<vmem>>, vector<64x192xf32>
    %cst_10 = arith.constant dense<0.000000e+00> : vector<16x192xf32>
    %22 = tpu.matmul %20, %21, %cst_10 {dimension_numbers = #tpu.dot_dimension_numbers<[1], [0], [0], [1], [0, 0, 1, 1], [], []>} : vector<16x64xf32>, vector<64x192xf32>, vector<16x192xf32> -> vector<16x192xf32>
    %c0_11 = arith.constant 0 : index
    %c0_12 = arith.constant 0 : index
    %23 = vector.load %arg5[%c0_11, %c0_12] : memref<1x192xf32, #tpu.memory_space<vmem>>, vector<1x192xf32>
    %24 = vector.broadcast %23 : vector<1x192xf32> to vector<16x192xf32>
    %25 = arith.addf %22, %24 : vector<16x192xf32>
    %26 = vector.extract_strided_slice %25 {offsets = [0, 0], sizes = [16, 64], strides = [1, 1]} : vector<16x192xf32> to vector<16x64xf32>
    %c0_13 = arith.constant 0 : index
    %c0_14 = arith.constant 0 : index
    %c0_15 = arith.constant 0 : index
    %27 = vector.load %arg6[%c0_13, %c0_14, %c0_15] : memref<1x16x64xf32, #tpu.memory_space<vmem>>, vector<1x16x64xf32>
    %28 = vector.shape_cast %27 : vector<1x16x64xf32> to vector<16x64xf32>
    %29 = vector.shape_cast %26 : vector<16x64xf32> to vector<1x16x64xf32>
    tpu.vector_store %arg6[%c0_13, %c0_14, %c0_15], %29 {strides = array<i32>} : memref<1x16x64xf32, #tpu.memory_space<vmem>>, vector<1x16x64xf32>,
    %30 = vector.extract_strided_slice %25 {offsets = [0, 64], sizes = [16, 64], strides = [1, 1]} : vector<16x192xf32> to vector<16x64xf32>
    %c0_16 = arith.constant 0 : index
    %c0_17 = arith.constant 0 : index
    %c0_18 = arith.constant 0 : index
    %31 = vector.load %arg7[%c0_16, %c0_17, %c0_18] : memref<1x16x64xf32, #tpu.memory_space<vmem>>, vector<1x16x64xf32>
    %32 = vector.shape_cast %31 : vector<1x16x64xf32> to vector<16x64xf32>
    %33 = vector.shape_cast %30 : vector<16x64xf32> to vector<1x16x64xf32>
    tpu.vector_store %arg7[%c0_16, %c0_17, %c0_18], %33 {strides = array<i32>} : memref<1x16x64xf32, #tpu.memory_space<vmem>>, vector<1x16x64xf32>,
    %34 = vector.extract_strided_slice %25 {offsets = [0, 128], sizes = [16, 64], strides = [1, 1]} : vector<16x192xf32> to vector<16x64xf32>
    %c0_19 = arith.constant 0 : index
    %c0_20 = arith.constant 0 : index
    %c0_21 = arith.constant 0 : index
    %35 = vector.load %arg8[%c0_19, %c0_20, %c0_21] : memref<1x16x64xf32, #tpu.memory_space<vmem>>, vector<1x16x64xf32>
    %36 = vector.shape_cast %35 : vector<1x16x64xf32> to vector<16x64xf32>
    %37 = vector.shape_cast %34 : vector<16x64xf32> to vector<1x16x64xf32>
    tpu.vector_store %arg8[%c0_19, %c0_20, %c0_21], %37 {strides = array<i32>} : memref<1x16x64xf32, #tpu.memory_space<vmem>>, vector<1x16x64xf32>,
    return
  }
  func.func @transform_0(%arg0: i32, %arg1: i32) -> (i32, i32, i32) {
    %c0_i32 = arith.constant 0 : i32
    %c0_i32_0 = arith.constant 0 : i32
    return %arg0, %arg1, %c0_i32 : i32, i32, i32
  }
  func.func @transform_1(%arg0: i32, %arg1: i32) -> (i32, i32) {
    %c0_i32 = arith.constant 0 : i32
    %c0_i32_0 = arith.constant 0 : i32
    %c0_i32_1 = arith.constant 0 : i32
    return %c0_i32, %c0_i32_0 : i32, i32
  }
  func.func @transform_2(%arg0: i32, %arg1: i32) -> (i32, i32) {
    %c0_i32 = arith.constant 0 : i32
    %c0_i32_0 = arith.constant 0 : i32
    %c0_i32_1 = arith.constant 0 : i32
    return %c0_i32, %c0_i32_0 : i32, i32
  }
  func.func @transform_3(%arg0: i32, %arg1: i32) -> (i32, i32) {
    %c0_i32 = arith.constant 0 : i32
    %c0_i32_0 = arith.constant 0 : i32
    %c0_i32_1 = arith.constant 0 : i32
    return %c0_i32, %c0_i32_0 : i32, i32
  }
  func.func @transform_4(%arg0: i32, %arg1: i32) -> (i32, i32, i32) {
    %c0_i32 = arith.constant 0 : i32
    %c0_i32_0 = arith.constant 0 : i32
    return %arg0, %arg1, %c0_i32 : i32, i32, i32
  }
  func.func @transform_5(%arg0: i32, %arg1: i32) -> (i32, i32, i32) {
    %c0_i32 = arith.constant 0 : i32
    %c0_i32_0 = arith.constant 0 : i32
    return %arg0, %arg1, %c0_i32 : i32, i32, i32
  }
  func.func @transform_6(%arg0: i32, %arg1: i32) -> (i32, i32, i32) {
    %c0_i32 = arith.constant 0 : i32
    %c0_i32_0 = arith.constant 0 : i32
    return %arg0, %arg1, %c0_i32 : i32, i32, i32
  }
}

</mosaic_0001>

<bundles_post_ra>
// kernel: tpu_custom_call.1
= control target key start
LH: loop header
LB: loop body
LE: loop exit
PB: predicated region body
PF: predicated region fallthrough
CT: control target
= control target key end

     0   :  { %s1635_s0 = inlined_call_operand.hbm [shape: f32[2,16,64], index: 0, kind: input, shape index: {}]   ;;  %s1636_s1 = inlined_call_operand.hbm [shape: f32[1,64], index: 1, kind: input, shape index: {}]   ;;  %s1637_s2 = inlined_call_operand.hbm [shape: f32[64,192], index: 2, kind: input, shape index: {}]   ;;  %s1638_s3 = inlined_call_operand.hbm [shape: f32[1,192], index: 3, kind: input, shape index: {}]   ;;  %s1639_s4 = inlined_call_operand.hbm [shape: f32[2,16,64], index: 4, kind: output, shape index: {0}]   ;;  %s1640_s5 = inlined_call_operand.hbm [shape: f32[2,16,64], index: 5, kind: output, shape index: {1}]   ;;  %s1641_s6 = inlined_call_operand.hbm [shape: f32[2,16,64], index: 6, kind: output, shape index: {2}]  }
   0x1   :  { %1646 = sst [smem:[#allocation19_spill]] %s1635_s0 }
   0x2   :  { %1647 = sst [smem:[#allocation20_spill]] %s1636_s1 }
   0x3   :  { %12 = vsyncpa [#allocation3], 0 }
   0x4   :  { %14 = vsyncpa [#allocation3 + $0x1], 0 }
   0x5   :  { %15 = vsyncpa [#allocation6], 0 }
   0x6   :  { %16 = vsyncpa [#allocation9], 0 }
   0x7   :  { %17 = vsyncpa [#allocation4], 0 }
   0x8   :  { %19 = vsyncpa [#allocation4 + $0x1], 0 }
   0x9   :  { %20 = vsyncpa [#allocation12], 0 }
   0xa   :  { %22 = vsyncpa [#allocation12 + $0x1], 0  ;;  %s1254_s21 = smov 0   ;;  %s1256_s22 = smov 0  }
   0xb   :  { %s1258_s23 = smov 0   ;;  %s1260_s24 = smov 0  }
   0xc   :  { %s1262_s25 = smov 0   ;;  %s1264_s26 = smov 0  }
   0xd LB: > { %s1285_s27 = sadd.s32 4294967295, %s1202_s26   ;;  %s1645_s28 = sadd.s32 4294967294, %s1202_s26   ;;  %s1202_s26 = sphi %s1264_s26, %s28_s26   ;;  %s1198_s25 = sphi %s1262_s25, %s1671_s25   ;;  %s1194_s24 = sphi %s1260_s24, %s1670_s24   ;;  %s1190_s23 = sphi %s1258_s23, %s1669_s23   ;;  %s1186_s22 = sphi %s1256_s22, %s1668_s22   ;;  %s1182_s21 = sphi %s1254_s21, %s1667_s21  }
   0xe   : > { %p62_p0 = scmp.ne.s32.totalorder %s1186_s22, %s1182_s21  ;;  %p1642_p1 = scmp.eq.s32.totalorder %s1285_s27, 0 }
   0xf   : > { %p157_p3 = scmp.eq.s32.totalorder %s1645_s28, 1  ;;  %p765_p5 = scmp.ge.s32.totalorder %s1202_s26, 1 }
  0x10   : > { %p1296_p4 = por %p1642_p1, %p62_p0  ;;  %p220_p7 = scmp.lt.s32.totalorder %s1202_s26, 3 }
  0x11   : > { %p1301_p6 = por %p157_p3, %p62_p0  ;;  %s1204_s8 = smov [#allocation5]  }
  0x12   : > { %s1648_s29 = scalar_select %p1296_p4, 1, 0 }
  0x13   : > { %s1649_s30 = scalar_select %p1301_p6, 1, 0 }
  0x14   : > { %p1306_p8 = pnand %p765_p5, %p220_p7  ;;  %s233_s9 = sshll.u32 %s1204_s8, 4  ;;  %s234_s9 = int_to_ptr.vmem [resolvable:$true] %s233_s9 }
  0x15   : > { %s1205_s10 = smov [#allocation7]   ;;  %s1206_s13 = smov [#allocation8]  }
  0x16   : > { %s1650_s7 = scalar_select %p1306_p8, 1, 0 }
  0x17   : > { %p843_p10 = pneg %p1306_p8  ;;  %s243_s11 = sshll.u32 %s1205_s10, 4  ;;  %s1319_s11 = int_to_ptr.vmem [resolvable:$true] %s243_s11 }
  0x18   : > { %s1321_s14 = sshll.u32 %s1206_s13, 4  ;;  %s1652_s1 = sld [smem:[#allocation20_spill]]  ;;  %s258_s14 = int_to_ptr.vmem [resolvable:$true] %s1321_s14 }
  0x19   : > { %p1315_p11 = pnand %p843_p10, %p1642_p1 }
  0x1b   : > { %p1331_p13 = pneg %p1315_p11 }
  0x1e   : > { %s938_s17 = scalar_lea.hbm %s1652_s1, 16 }
  0x1f   : > { %p939_p12 = scmp.ne.s32.totalorder %s1652_s1, %s938_s17  ;;  %p945_p5 = scmp.lt.u32.totalorder %s938_s17, %s1652_s1 }
  0x21   : > { %p941_p0 = pnand %p1331_p13, %p939_p12 }
  0x23   : > { %p942_p3 = pneg %p941_p0 }
  0x25   : > { %p947_p7 = pnand %p945_p5, %p942_p3 }
  0x27   : > { %950 = shalt.err (!%p947_p7)
}
  0x28   : > { %s951_s13 = scalar_lea.vmem %s234_s9, 16  ;;  %s958_s15 = scalar_lea.vmem %s234_s9, 32 }
  0x29   : > { %p952_p10 = scmp.ne.s32.totalorder %s234_s9, %s951_s13  ;;  %p959_p2 = scmp.lt.s32.totalorder %s234_s9, %s234_s9 }
  0x2a   : > { %p960_p6 = scmp.lt.s32.totalorder %s958_s15, %s951_s13 }
  0x2b   : > { %p954_p9 = pnand %p952_p10, %p1331_p13 }
  0x2c   : > { %p961_p4 = por %p960_p6, %p959_p2 }
  0x2d   : > { %p955_p1 = pneg %p954_p9 }
  0x2f   : > { %p962_p8 = pnand %p961_p4, %p955_p1 }
  0x31   : > { %965 = shalt.err (!%p962_p8)
}
  0x32   : > { %846 = dma.hbm_to_vmem [thread:$0]  (!%p1315_p11), %s1652_s1, 16, %s234_s9, [#allocation6]  }
  0x33   : > { %s966_s8 = scalar_lea.hbm %s1637_s2, 2048 }
  0x34   : > { %p967_p9 = scmp.ne.s32.totalorder %s1637_s2, %s966_s8  ;;  %p973_p1 = scmp.lt.u32.totalorder %s966_s8, %s1637_s2 }
  0x36   : > { %p969_p12 = pnand %p967_p9, %p1331_p13 }
  0x38   : > { %p970_p2 = pneg %p969_p12 }
  0x3a   : > { %p975_p4 = pnand %p973_p1, %p970_p2 }
  0x3c   : > { %978 = shalt.err (!%p975_p4)
}
  0x3d   : > { %s979_s9 = scalar_lea.vmem %s1319_s11, 2048  ;;  %p987_p3 = scmp.lt.s32.totalorder %s1319_s11, %s1319_s11 }
  0x3e   : > { %p980_p6 = scmp.ne.s32.totalorder %s1319_s11, %s979_s9  ;;  %p988_p5 = scmp.lt.s32.totalorder %s979_s9, %s979_s9 }
  0x40   : > { %p982_p8 = pnand %p980_p6, %p1331_p13  ;;  %p989_p7 = por %p988_p5, %p987_p3 }
  0x42   : > { %p983_p0 = pneg %p982_p8 }
  0x44   : > { %p990_p10 = pnand %p989_p7, %p983_p0 }
  0x46   : > { %993 = shalt.err (!%p990_p10)
}
  0x47   : > { %s1207_s28 = smov 256   ;;  %s1208_s16 = smov 16  }
  0x48   : > { %849 = dma.hbm_to_vmem [thread:$0]  (!%p1315_p11), %s1637_s2, 2048, %s1319_s11, [#allocation6], %s1207_s28, %s1207_s28, %s1208_s16  }
  0x49   : > { %s994_s10 = scalar_lea.hbm %s1638_s3, 32 }
  0x4a   : > { %p995_p9 = scmp.ne.s32.totalorder %s1638_s3, %s994_s10  ;;  %p1001_p1 = scmp.lt.u32.totalorder %s994_s10, %s1638_s3 }
  0x4c   : > { %p997_p12 = pnand %p995_p9, %p1331_p13 }
  0x4e   : > { %p998_p2 = pneg %p997_p12 }
  0x50   : > { %p1003_p4 = pnand %p1001_p1, %p998_p2 }
  0x52   : > { %1006 = shalt.err (!%p1003_p4)
}
  0x53   : > { %s1007_s18 = scalar_lea.vmem %s258_s14, 32  ;;  %p1015_p3 = scmp.lt.s32.totalorder %s258_s14, %s258_s14 }
  0x54   : > { %p1008_p6 = scmp.ne.s32.totalorder %s258_s14, %s1007_s18  ;;  %p1016_p5 = scmp.lt.s32.totalorder %s1007_s18, %s1007_s18 }
  0x56   : > { %p1010_p8 = pnand %p1008_p6, %p1331_p13  ;;  %p1017_p7 = por %p1016_p5, %p1015_p3 }
  0x58   : > { %p1011_p0 = pneg %p1010_p8 }
  0x5a   : > { %p1018_p10 = pnand %p1017_p7, %p1011_p0 }
  0x5c   : > { %1021 = shalt.err (!%p1018_p10)
}
  0x5d   : > { %852 = dma.hbm_to_vmem [thread:$0]  (!%p1315_p11), %s1638_s3, 32, %s258_s14, [#allocation9]  }
  0x5e   : > { %s49_s1 = sadd.s32 1, %s1190_s23  ;;  %s40_s20 = sadd.s32 1, %s1198_s25 }
  0x5f   : > { %p56_p13 = scmp.ne.s32.totalorder %s1190_s23, %s1186_s22  ;;  %p42_p9 = scmp.ge.s32.totalorder %s40_s20, 2 }
  0x60   : > { %p57_p12 = scmp.eq.s32.totalorder %s1202_s26, 0  ;;  %p1654_p2 = scmp.eq.s32.totalorder %s1285_s27, 1 }
  0x61   : > { %p870_p4 = scmp.lt.s32.totalorder %s1202_s26, 2  ;;  %s1673_s20 = smov (%p42_p9, %s40_s20), 0 }
  0x62   : > { %p1396_p1 = por %p1654_p2, %p56_p13  ;;  %p58_p6 = por %p57_p12, %p56_p13 }
  0x63   : > { %s268_s16 = sand.u32 1, %s1190_s23   ;;  %s44_s17 = ssub.s32 %s1198_s25, %s1673_s20 }
  0x64   : > { %p47_p8 = scmp.eq.s32.totalorder %s44_s17, 0  ;;  %s770_s14 = sshll.u32 %s268_s16, 4 }
  0x65   : > { %s795_s19 = sshll.u32 %s1198_s25, 8  ;;  %s1656_s0 = sld [smem:[#allocation19_spill]] }
  0x66   : > { %s1408_s8 = scalar_select %p47_p8, %s1190_s23, %s49_s1  }
  0x67   : > { %s272_s9 = scalar_lea.vmem [#allocation2], %s770_s14  ;;  %p1419_p11 = pnand %p870_p4, %p58_p6 }
  0x68   : > { %s281_s18 = sshll.u32 %s272_s9, 4  ;;  %s1423_s28 = scalar_lea.sflag [#allocation3], %s268_s16  ;;  %s1415_s18 = int_to_ptr.vmem [resolvable:$true] %s281_s18 }
  0x69   : > { %p1024_p3 = pneg %p1419_p11 }
  0x6b   : > { %s1413_s15 = scalar_lea.hbm %s1656_s0, %s795_s19  ;;  %s1027_s19 = scalar_lea.hbm %s1656_s0, 512 }
  0x6c   : > { %s1022_s1 = scalar_lea.hbm %s1413_s15, 256  ;;  %p1028_p10 = scmp.lt.u32.totalorder %s1413_s15, %s1656_s0 }
  0x6d   : > { %p1023_p0 = scmp.ne.s32.totalorder %s1413_s15, %s1022_s1  ;;  %p1029_p13 = scmp.lt.u32.totalorder %s1027_s19, %s1022_s1 }
  0x6e   : > { %p1031_p12 = scmp.lt.u32.totalorder %s1022_s1, %s1413_s15 }
  0x6f   : > { %p1025_p5 = pnand %p1024_p3, %p1023_p0  ;;  %p1030_p9 = por %p1029_p13, %p1028_p10 }
  0x71   : > { %p1026_p7 = pneg %p1025_p5  ;;  %p1032_p2 = por %p1031_p12, %p1030_p9 }
  0x73   : > { %p1033_p4 = pnand %p1032_p2, %p1026_p7 }
  0x75   : > { %1036 = shalt.err (!%p1033_p4)
}
  0x76   : > { %s1037_s16 = scalar_lea.vmem %s1415_s18, 256  ;;  %s1209_s9 = smov [#allocation2]  }
  0x77   : > { %p1038_p6 = scmp.ne.s32.totalorder %s1415_s18, %s1037_s16  ;;  %s1042_s17 = sshll.u32 %s1209_s9, 4  ;;  %s1043_s17 = int_to_ptr.vmem [resolvable:$false] %s1042_s17 }
  0x78   : > { %s1044_s14 = scalar_lea.vmem %s1043_s17, 512  ;;  %p1045_p5 = scmp.lt.s32.totalorder %s1415_s18, %s1043_s17 }
  0x79   : > { %p1040_p8 = pnand %p1038_p6, %p1024_p3  ;;  %p1046_p10 = scmp.lt.s32.totalorder %s1044_s14, %s1037_s16 }
  0x7b   : > { %p1041_p0 = pneg %p1040_p8  ;;  %p1047_p13 = por %p1046_p10, %p1045_p5 }
  0x7d   : > { %p1048_p9 = pnand %p1047_p13, %p1041_p0 }
  0x7f   : > { %1051 = shalt.err (!%p1048_p9)
}
  0x80   : > { %s1210_s1 = smov 128   ;;  %s1211_s19 = smov 8  }
  0x81   : > { %856 = dma.hbm_to_vmem [thread:$0]  (!%p1419_p11), %s1413_s15, 256, %s1415_s18, %s1423_s28, %s1210_s1, %s1210_s1, %s1211_s19  }
  0x82   : > { %p1658_p3 = scmp.ne.s32.totalorder %s1650_s7, 0 }
  0x83   : > { %s1454_s10 = sand.u32 (!%p1658_p3), 1, %s1186_s22   ;;  %p1659_p7 = scmp.ne.s32.totalorder (!%p1658_p3), %s1648_s29, 0 }
  0x84   : > { %293 = sbr.rel (%p1658_p3) target bundleno = 827 (0x33b), region = 36  ;;  %s1457_s13 = sshll.u32 (!%p1658_p3), %s1454_s10, 4 }
  0x85   : > { %s296_s16 = scalar_lea.sflag (!%p1658_p3), [#allocation3], %s1454_s10  ;;  %s299_s9 = scalar_lea.vmem (!%p1658_p3), [#allocation2], %s1457_s13 }
  0x8b   : > { %1161 = dma.done.wait (%p1659_p7), %s296_s16, 256  }
  0x8c   : > { %1163 = vsyncadd (%p1659_p7), %s296_s16, 4294967040  ;;  %p1660_p11 = scmp.eq.s32.totalorder %s1285_s27, 0 }
  0x8e   : > { %1165 = dma.done.wait (%p1660_p11), [#allocation6], 2064   ;;  %p1661_p12 = pmov %p1660_p11 }
  0x8f   : > { %p1662_p2 = pmov %p1660_p11 }
  0x90   : > { %1167 = vsyncadd (%p1661_p12), [#allocation6], 4294965232 }
  0x91   : > { %1169 = dma.done.wait (%p1662_p2), [#allocation9], 32   ;;  %p1663_p4 = pmov %p1662_p2 }
  0x92   : > { %vm357_vm0 = vcmask 523264   ;;  %v354_v0 = vld [vmem:[%s299_s9] sm:$0xff]  ;;  %v355_v1 = vld [vmem:[%s299_s9 + $0x8] sm:$0xff]  ;;  %v1212_v33 = vmov 0.0   ;;  %v411_v52 = vlaneseq  ;;  %s335_s29 = scalar_lea.vmem [#allocation10], %s1457_s13  ;;  %s1491_s15 = sshll.u32 %s1194_s24, 8 }
  0x93   : > { %1171 = vsyncadd (%p1663_p4), [#allocation9], 4294967264  ;;  %v358_v2 = vsel %vm357_vm0, %v354_v0, 0.0  ;;  %v361_v3 = vsel %vm357_vm0, %v355_v1, 0.0  ;;  %v394_v14 = vld [vmem:[#allocation7 + $0x8] sm:$0xff]  ;;  %v396_v15 = vld [vmem:[#allocation7 + $0x18] sm:$0xff]  ;;  %491 = vmatprep.mubr.f32.mxu0 %v1212_v33  ;;  %497 = vmatprep.mubr.f32.mxu1 %v1212_v33  ;;  %s1505_s17 = scalar_lea.hbm %s1639_s4, %s1491_s15 }
  0x94   : > { %359 = vadd.xlane.f32.xlu0 %v358_v2  ;;  %v799_v16 = vpack.c.bf16 %v396_v15, %v394_v14  ;;  %v393_v17 = vld [vmem:[#allocation7] sm:$0xff]  ;;  %v395_v18 = vld [vmem:[#allocation7 + $0x10] sm:$0xff]  ;;  %v398_v20 = vld [vmem:[#allocation7 + $0x28] sm:$0xff]  ;;  %v412_v53 = vshrl.u32 %v411_v52, 7  ;;  %s544_s7 = sshll.u32 %s335_s29, 4  ;;  %s1213_s18 = smov 64   ;;  %s1494_s7 = int_to_ptr.vmem [resolvable:$true] %s544_s7 }
  0x95   : > { %v801_v19 = vpack.c.bf16 %v395_v18, %v393_v17  ;;  %v400_v21 = vld [vmem:[#allocation7 + $0x38] sm:$0xff]  ;;  %v397_v23 = vld [vmem:[#allocation7 + $0x20] sm:$0xff]  ;;  %v399_v24 = vld [vmem:[#allocation7 + $0x30] sm:$0xff]  ;;  %s1497_s11 = scalar_lea.vmem [#allocation13], %s1457_s13  ;;  %s519_s14 = scalar_lea.sflag [#allocation4], %s1454_s10 }
  0x96   : > { %800 = vmatprep.subr.bf16.mxu0 %v799_v16  ;;  %815 = vmatprep.subr.bf16.mxu1 %v799_v16  ;;  %v803_v22 = vpack.c.bf16 %v400_v21, %v398_v20  ;;  %v805_v25 = vpack.c.bf16 %v399_v24, %v397_v23  ;;  %v402_v26 = vld [vmem:[#allocation7 + $0x48] sm:$0xff]  ;;  %v404_v27 = vld [vmem:[#allocation7 + $0x58] sm:$0xff]  ;;  %v401_v28 = vld [vmem:[#allocation7 + $0x40] sm:$0xff]  ;;  %v413_v54 = vsub.s32 0, %v412_v53  ;;  %v417_v56 = vsub.s32 1, %v412_v53  ;;  %s1052_s1 = scalar_lea.vmem %s1494_s7, 256 }
  0x97   : > { %802 = vmatpush1.bf16.msra.mxu0 %v801_v19  ;;  %819 = vmatpush1.bf16.msra.mxu1 %v801_v19  ;;  %v807_v29 = vpack.c.bf16 %v404_v27, %v402_v26  ;;  %v403_v30 = vld [vmem:[#allocation7 + $0x50] sm:$0xff]  ;;  %v406_v31 = vld [vmem:[#allocation7 + $0x68] sm:$0xff]  ;;  %v408_v32 = vld [vmem:[#allocation7 + $0x78] sm:$0xff]  ;;  %p1053_p6 = scmp.ne.s32.totalorder %s1494_s7, %s1052_s1  ;;  %s1214_s19 = smov [#allocation10]  }
  0x98   : > { %362 = vadd.xlane.f32.xlu0 %v361_v3  ;;  %804 = vmatprep.subr.bf16.mxu0 %v803_v22  ;;  %v809_v34 = vpack.c.bf16 %v403_v30, %v401_v28  ;;  %v811_v35 = vpack.c.bf16 %v408_v32, %v406_v31  ;;  %v405_v36 = vld [vmem:[#allocation7 + $0x60] sm:$0xff]  ;;  %v407_v37 = vld [vmem:[#allocation7 + $0x70] sm:$0xff]  ;;  %v781_v46 = vld [vmem:[#allocation5] ss:$0 sm:$0xff]  ;;  %s1056_s16 = sshll.u32 %s1214_s19, 4  ;;  %s1057_s16 = int_to_ptr.vmem [resolvable:$false] %s1056_s16 }
  0x99   : > { %816 = vmatprep.subr.bf16.mxu1 %v803_v22  ;;  %v813_v38 = vpack.c.bf16 %v407_v37, %v405_v36  ;;  %v409_v55 = vld [vmem:[#allocation8] sm:$0x3]  ;;  %p1054_p8 = pnand %p1053_p6, %p1396_p1  ;;  %s1058_s9 = scalar_lea.vmem %s1057_s16, 512 }
  0x9a   : > { %v414_v57 = vrot.slane %v409_v55, %v413_v54  ;;  %v418_v58 = vrot.slane %v409_v55, %v417_v56  ;;  %p1059_p5 = scmp.lt.s32.totalorder %s1494_s7, %s1057_s16  ;;  %p1060_p10 = scmp.lt.s32.totalorder %s1058_s9, %s1052_s1 }
  0x9b   : > { %806 = vmatpush1.bf16.msra.mxu0 %v805_v25  ;;  %820 = vmatpush1.bf16.msra.mxu1 %v805_v25  ;;  %p1055_p0 = pneg %p1054_p8 }
  0x9c   : > { %808 = vmatprep.subr.bf16.mxu0 %v807_v29  ;;  %817 = vmatprep.subr.bf16.mxu1 %v807_v29  ;;  %p1061_p13 = por %p1060_p10, %p1059_p5 }
  0x9e   : > { %p1062_p9 = pnand %p1061_p13, %p1055_p0 }
  0x9f   : > { %810 = vmatpush1.bf16.msra.mxu0 %v809_v34  ;;  %821 = vmatpush1.bf16.msra.mxu1 %v809_v34 }
  0xa0   : > { %812 = vmatprep.subr.bf16.mxu0 %v811_v35  ;;  %818 = vmatprep.subr.bf16.mxu1 %v811_v35 }
  0xa3   : > { %814 = vmatpush1.bf16.msra.mxu0 %v813_v38  ;;  %822 = vmatpush1.bf16.msra.mxu1 %v813_v38 }
 0x121   : > { %v360_v4 = vpop.xlane.xlu0 %359 }
 0x122   : > { %v365_v5 = vmul.f32 0.015625, %v360_v4 }
 0x124   : > { %v1475_v6 = vsub.f32 %v354_v0, %v365_v5 }
 0x125   : > { %v363_v7 = vpop.xlane.xlu0 %362 }
 0x126   : > { %v366_v8 = vmul.f32 0.015625, %v363_v7  ;;  %v369_v9 = vmul.f32 %v1475_v6, %v1475_v6 }
 0x128   : > { %v1479_v10 = vsub.f32 %v355_v1, %v366_v8  ;;  %v371_v11 = vsel %vm357_vm0, %v369_v9, 0.0 }
 0x129   : > { %372 = vadd.xlane.f32.xlu1 %v371_v11 }
 0x12a   : > { %v370_v12 = vmul.f32 %v1479_v10, %v1479_v10 }
 0x12c   : > { %v374_v13 = vsel %vm357_vm0, %v370_v12, 0.0 }
 0x12d   : > { %375 = vadd.xlane.f32.xlu1 %v374_v13 }
 0x1b6   : > { %v373_v39 = vpop.xlane.xlu1 %372 }
 0x1b7   : > { %v377_v40 = vmul.f32 0.015625, %v373_v39 }
 0x1b9   : > { %v379_v41 = vadd.f32 1e-05, %v377_v40 }
 0x1ba   : > { %v376_v42 = vpop.xlane.xlu1 %375 }
 0x1bb   : > { %934 = vrsqrt.f32 %v379_v41  ;;  %v378_v43 = vmul.f32 0.015625, %v376_v42 }
 0x1bd   : > { %v380_v44 = vadd.f32 1e-05, %v378_v43 }
 0x1bf   : > { %936 = vrsqrt.f32 %v380_v44 }
 0x1c5   : > { %v935_v45 = vpop.eup %934 }
 0x1c6   : > { %v383_v47 = vmul.f32 %v935_v45, %v1475_v6 }
 0x1c8   : > { %v391_v48 = vmul.f32 %v781_v46, %v383_v47 }
 0x1c9   : > { %v937_v49 = vpop.eup %936 }
 0x1ca   : > { %782 = vmatmul.mubr.msk.f32.vlgmr.msra.gmra.mrb[0].mxu0 %vm357_vm0, %v391_v48  ;;  %v384_v50 = vmul.f32 %v937_v49, %v1479_v10 }
 0x1cc   : > { %v392_v51 = vmul.f32 %v781_v46, %v384_v50 }
 0x1ce   : > { %783 = vmatmul.mubr.msk.f32.vlgmr.msra.gmra.mrb[0].mxu1 %vm357_vm0, %v392_v51 }
 0x29d   : > { %v493_v59 = vpop.f32.mrb[0].mxu0 }
 0x29e   : > { %v494_v60 = vadd.f32 %v493_v59, %v414_v57  ;;  %v495_v61 = vpop.f32.mrb[1].mxu0 }
 0x29f   : > { %v496_v62 = vadd.f32 %v495_v61, %v418_v58 }
 0x2a0   : > { %504 = vst.msk [vmem:[%s335_s29] sm:$0xff] %vm357_vm0, %v494_v60  ;;  %508 = vrot.lane.b32.xlu0 %v494_v60, %s1213_s18 }
 0x2a1   : > { %516 = vst.msk [vmem:[%s1497_s11] sm:$0xff] %vm357_vm0, %v496_v62  ;;  %v499_v63 = vpop.f32.mrb[0].mxu1 }
 0x2a2   : > { %v500_v0 = vadd.f32 %v499_v63, %v414_v57  ;;  %v501_v1 = vpop.f32.mrb[1].mxu1 }
 0x2a3   : > { %v502_v2 = vadd.f32 %v501_v1, %v418_v58 }
 0x2a4   : > { %505 = vst.msk [vmem:[%s335_s29 + $0x8] sm:$0xff] %vm357_vm0, %v500_v0  ;;  %510 = vrot.lane.b32.xlu1 %v500_v0, %s1213_s18 }
 0x2a5   : > { %517 = vst.msk [vmem:[%s1497_s11 + $0x8] sm:$0xff] %vm357_vm0, %v502_v2 }
 0x2a6   : > { %1065 = shalt.err (!%p1062_p9)
}
 0x2a7   : > { %s1066_s29 = scalar_lea.hbm %s1505_s17, 256  ;;  %s1070_s28 = scalar_lea.hbm %s1639_s4, 512 }
 0x2a8   : > { %p1067_p3 = scmp.ne.s32.totalorder %s1505_s17, %s1066_s29  ;;  %p1071_p12 = scmp.lt.u32.totalorder %s1505_s17, %s1639_s4 }
 0x2a9   : > { %p1072_p2 = scmp.lt.u32.totalorder %s1070_s28, %s1066_s29  ;;  %p1074_p6 = scmp.lt.u32.totalorder %s1066_s29, %s1505_s17 }
 0x2aa   : > { %p1068_p7 = pnand %p1067_p3, %p1396_p1 }
 0x2ab   : > { %p1073_p4 = por %p1072_p2, %p1071_p12 }
 0x2ac   : > { %p1069_p11 = pneg %p1068_p7 }
 0x2ad   : > { %p1075_p8 = por %p1074_p6, %p1073_p4 }
 0x2af   : > { %p1076_p0 = pnand %p1075_p8, %p1069_p11 }
 0x2b1   : > { %1079 = shalt.err (!%p1076_p0)
}
 0x2b2   : > { %s1215_s1 = smov 128   ;;  %s1216_s9 = smov 8  }
 0x2b3   : > { %837 = dma.vmem_to_hbm [thread:$0]  (%p1396_p1), %s1494_s7, 256, %s1505_s17, %s519_s14, %s1215_s1, %s1215_s1, %s1216_s9  }
 0x2b4   : > { %s342_s29 = scalar_lea.vmem [#allocation11], %s1457_s13  ;;  %s523_s24 = sand.u32 1, %s1285_s27  }
 0x2b5   : > { %s562_s18 = sshll.u32 %s342_s29, 4  ;;  %s580_s28 = sshll.u32 %s1497_s11, 4  ;;  %s1541_s18 = int_to_ptr.vmem [resolvable:$true] %s562_s18  ;;  %s1549_s28 = int_to_ptr.vmem [resolvable:$true] %s580_s28 }
 0x2b6   : > { %s1547_s0 = scalar_lea.hbm %s1640_s5, %s1491_s15  ;;  %s1555_s27 = scalar_lea.hbm %s1641_s6, %s1491_s15 }
 0x2b7   : > { %s1558_s7 = scalar_lea.sflag [#allocation12], %s523_s24  ;;  %s1080_s11 = scalar_lea.vmem %s1541_s18, 256 }
 0x2b8   : > { %p1081_p5 = scmp.ne.s32.totalorder %s1541_s18, %s1080_s11  ;;  %s1217_s17 = smov [#allocation11]  }
 0x2b9   : > { %s1084_s14 = sshll.u32 %s1217_s17, 4  ;;  %s1085_s14 = int_to_ptr.vmem [resolvable:$false] %s1084_s14 }
 0x2ba   : > { %p1082_p10 = pnand %p1081_p5, %p1396_p1  ;;  %s1086_s19 = scalar_lea.vmem %s1085_s14, 512 }
 0x2bb   : > { %p1087_p9 = scmp.lt.s32.totalorder %s1541_s18, %s1085_s14  ;;  %p1088_p3 = scmp.lt.s32.totalorder %s1086_s19, %s1080_s11 }
 0x2bc   : > { %p1083_p13 = pneg %p1082_p10 }
 0x2bd   : > { %p1089_p7 = por %p1088_p3, %p1087_p9 }
 0x2bf   : > { %p1090_p11 = pnand %p1089_p7, %p1083_p13 }
 0x312   : > { %v509_v3 = vpop.permute.xlu0 %508 }
 0x313   : > { %514 = vst.msk [vmem:[%s342_s29] sm:$0xff] %vm357_vm0, %v509_v3 }
 0x316   : > { %v511_v4 = vpop.permute.xlu1 %510 }
 0x317   : > { %515 = vst.msk [vmem:[%s342_s29 + $0x8] sm:$0xff] %vm357_vm0, %v511_v4 }
 0x318   : > { %1093 = shalt.err (!%p1090_p11)
}
 0x319   : > { %s1094_s15 = scalar_lea.hbm %s1547_s0, 256  ;;  %s1098_s16 = scalar_lea.hbm %s1640_s5, 512 }
 0x31a   : > { %p1095_p12 = scmp.ne.s32.totalorder %s1547_s0, %s1094_s15  ;;  %p1099_p6 = scmp.lt.u32.totalorder %s1547_s0, %s1640_s5 }
 0x31b   : > { %p1100_p8 = scmp.lt.u32.totalorder %s1098_s16, %s1094_s15  ;;  %p1102_p5 = scmp.lt.u32.totalorder %s1094_s15, %s1547_s0 }
 0x31c   : > { %p1096_p2 = pnand %p1095_p12, %p1396_p1 }
 0x31d   : > { %p1101_p0 = por %p1100_p8, %p1099_p6 }
 0x31e   : > { %p1097_p4 = pneg %p1096_p2 }
 0x31f   : > { %p1103_p10 = por %p1102_p5, %p1101_p0 }
 0x321   : > { %p1104_p13 = pnand %p1103_p10, %p1097_p4 }
 0x323   : > { %1107 = shalt.err (!%p1104_p13)
}
 0x324   : > { %838 = dma.vmem_to_hbm [thread:$0]  (%p1396_p1), %s1541_s18, 256, %s1547_s0, %s1558_s7, %s1215_s1, %s1215_s1, %s1216_s9  }
 0x325   : > { %s1108_s11 = scalar_lea.vmem %s1549_s28, 256  ;;  %s1218_s17 = smov [#allocation13]  }
 0x326   : > { %p1109_p9 = scmp.ne.s32.totalorder %s1549_s28, %s1108_s11  ;;  %s1112_s14 = sshll.u32 %s1218_s17, 4  ;;  %s1113_s14 = int_to_ptr.vmem [resolvable:$false] %s1112_s14 }
 0x327   : > { %s1114_s19 = scalar_lea.vmem %s1113_s14, 512  ;;  %p1115_p11 = scmp.lt.s32.totalorder %s1549_s28, %s1113_s14 }
 0x328   : > { %p1110_p3 = pnand %p1109_p9, %p1396_p1  ;;  %p1116_p12 = scmp.lt.s32.totalorder %s1114_s19, %s1108_s11 }
 0x32a   : > { %p1111_p7 = pneg %p1110_p3  ;;  %p1117_p2 = por %p1116_p12, %p1115_p11 }
 0x32c   : > { %p1118_p4 = pnand %p1117_p2, %p1111_p7 }
 0x32e   : > { %1121 = shalt.err (!%p1118_p4)
}
 0x32f   : > { %s1122_s0 = scalar_lea.hbm %s1555_s27, 256  ;;  %s1126_s29 = scalar_lea.hbm %s1641_s6, 512 }
 0x330   : > { %p1123_p6 = scmp.ne.s32.totalorder %s1555_s27, %s1122_s0  ;;  %p1127_p5 = scmp.lt.u32.totalorder %s1555_s27, %s1641_s6 }
 0x331   : > { %p1128_p10 = scmp.lt.u32.totalorder %s1126_s29, %s1122_s0  ;;  %p1130_p9 = scmp.lt.u32.totalorder %s1122_s0, %s1555_s27 }
 0x332   : > { %p1124_p8 = pnand %p1123_p6, %p1396_p1 }
 0x333   : > { %p1129_p13 = por %p1128_p10, %p1127_p5 }
 0x334   : > { %p1125_p0 = pneg %p1124_p8 }
 0x335   : > { %p1131_p3 = por %p1130_p9, %p1129_p13 }
 0x337   : > { %p1132_p7 = pnand %p1131_p3, %p1125_p0 }
 0x339   : > { %1135 = shalt.err (!%p1132_p7)
}
 0x33a   : > { %839 = dma.vmem_to_hbm [thread:$0]  (%p1396_p1), %s1549_s28, 256, %s1555_s27, %s1558_s7, %s1215_s1, %s1215_s1, %s1216_s9  }
 0x33b PF: > { %s595_s10 = sand.u32 1, %s1182_s21   ;;  %p1664_p11 = scmp.ne.s32.totalorder %s1649_s30, 0 }
 0x33c   : > { %p1665_p12 = scmp.ge.s32.totalorder %s1202_s26, 2  ;;  %s596_s13 = scalar_lea.sflag [#allocation4], %s595_s10 }
 0x33e   : > { %p858_p2 = pnand %p1665_p12, %p1664_p11 }
 0x340   : > { %1173 = dma.done.wait (!%p858_p2), %s596_s13, 256  }
 0x341   : > { %1175 = vsyncadd (!%p858_p2), %s596_s13, 4294967040  ;;  %s1666_s12 = sadd.s32 4294967294, %s1202_s26  }
 0x342   : > { %s604_s11 = sand.u32 1, %s1666_s12  }
 0x343   : > { %s605_s17 = scalar_lea.sflag [#allocation12], %s604_s11 }
 0x344   : > { %1177 = dma.done.wait (!%p858_p2), %s605_s17, 512  }
 0x345   : > { %1179 = vsyncadd (!%p858_p2), %s605_s17, 4294966784  ;;  %s28_s26 = sadd.s32 1, %s1202_s26   ;;  %s1667_s21 = smov %s1186_s22 }
 0x346   : > { %p25_p1 = scmp.ge.s32.totalorder %s28_s26, 4   ;;  %s1668_s22 = smov %s1190_s23 }
 0x347   : > { %s1669_s23 = smov %s1408_s8  ;;  %s1670_s24 = smov %s1198_s25 }
 0x348   : > { %s1671_s25 = smov %s1673_s20  ;;  %27 = sbr.rel (!%p25_p1) target bundleno = 13 (0xd), region = 125 }
 0x34f   :  { %619 = vsyncpa [#allocation3], 1 }
 0x350   :  { %621 = vsyncpa [#allocation3 + $0x1], 1 }
 0x351   :  { %622 = vsyncpa [#allocation6], 1 }
 0x352   :  { %623 = vsyncpa [#allocation9], 1 }
 0x353   :  { %624 = vsyncpa [#allocation4], 1 }
 0x354   :  { %626 = vsyncpa [#allocation4 + $0x1], 1 }
 0x355   :  { %627 = vsyncpa [#allocation12], 1 }
 0x356   :  { %629 = vsyncpa [#allocation12 + $0x1], 1 }

</bundles_post_ra>
